<compile_context>
chip_gen: v7x
topology: tpu7x:2x2x1
jax: 0.10.0
libtpu: 0.0.40
codegen_flags: <defaults>
</compile_context>

<pallas_src>
import functools

import jax
import jax.numpy as jnp
from jax.experimental import pallas as pl
from jax.experimental.pallas import tpu as pltpu


def _round_up(x: int, m: int) -> int:
    return ((x + m - 1) // m) * m


def _attention_kernel(x_ref, x0_ref, wq_ref, wk_ref, wv_ref, o_ref, *, tb, L, dout):
    # x_ref:  (tb*L, din) f32   tb batches, L rows each (batch-major slab)
    # x0_ref: (tb, din)   f32   row 0 of each batch (the only query kept)
    # w*_ref: (din, dout) bf16  transposed nn.Linear weights; wq pre-scaled by 1/sqrt(dout)
    # o_ref:  (tb, dout)  f32   attention output of query row 0 per batch
    xb = x_ref[...].astype(jnp.bfloat16)
    x0 = x0_ref[...].astype(jnp.bfloat16)

    # bf16 MXU passes, f32 accumulation.  K / V projected for the full slab,
    # Q only for the kept row-0 queries -> no lane slicing of a fused result.
    k = jnp.dot(xb, wk_ref[...], preferred_element_type=jnp.float32)    # (tb*L, dout)
    v = jnp.dot(xb, wv_ref[...], preferred_element_type=jnp.float32)    # (tb*L, dout)
    q0 = jnp.dot(x0, wq_ref[...], preferred_element_type=jnp.float32)   # (tb, dout), pre-scaled

    k3 = k.reshape(tb, L, dout)                                         # free reshape
    v3 = v.reshape(tb, L, dout)

    # Row-0 attention scores, 2-D (tb, L): no trailing-1 lane dimension.
    s = jnp.sum(k3 * q0[:, None, :], axis=-1)                           # (tb, L)
    s = s - jnp.max(s, axis=-1, keepdims=True)
    p = jnp.exp(s)                                                      # (tb, L)
    w = p / jnp.sum(p, axis=-1, keepdims=True)                          # exact softmax

    out = jnp.sum(w[:, :, None] * v3, axis=1)                           # (tb, dout)
    o_ref[...] = out.astype(o_ref.dtype)


def _run_chunk(xf, x0, wq_t, wk_t, wv_t, n_blocks, tb, L):
    """Run the kernel on n_blocks tiles of tb batches each (no padding here)."""
    din = xf.shape[1]
    dout = wq_t.shape[1]
    nb = int(n_blocks)

    kernel = functools.partial(_attention_kernel, tb=tb, L=L, dout=dout)

    flops = (2 * nb * tb * L * din * dout) * 2 \
        + 2 * nb * tb * din * dout \
        + 6 * nb * tb * L * dout
    cost = pl.CostEstimate(
        flops=flops,
        transcendentals=nb * tb * L,
        bytes_accessed=xf.size * 4 + x0.size * 4
        + (wq_t.size + wk_t.size + wv_t.size) * 2
        + nb * tb * dout * 4)

    return pl.pallas_call(
        kernel,
        out_shape=jax.ShapeDtypeStruct((nb * tb, dout), jnp.float32),
        grid_spec=pltpu.PrefetchScalarGridSpec(
            num_scalar_prefetch=0,
            grid=(nb,),
            in_specs=[
                pl.BlockSpec((tb * L, din), lambda b: (b, 0)),
                pl.BlockSpec((tb, din), lambda b: (b, 0)),
                pl.BlockSpec((din, dout), lambda b: (0, 0)),
                pl.BlockSpec((din, dout), lambda b: (0, 0)),
                pl.BlockSpec((din, dout), lambda b: (0, 0)),
            ],
            out_specs=pl.BlockSpec((tb, dout), lambda b: (b, 0)),
        ),
        compiler_params=pltpu.CompilerParams(
            dimension_semantics=("parallel",),
            # Narrow (<128-lane) tiles are lane-padded in VMEM, so real usage is
            # ~4x nominal; raise above v5e's 16 MiB scoped default, stay within
            # every generation's physical VMEM.
            vmem_limit_bytes=32 * 1024 * 1024,
        ),
        cost_estimate=cost,
    )(xf, x0, wq_t, wk_t, wv_t)


def attention_forward(x, wq, wk, wv, *, tb_target=512):
    """x: (sz_b, sz_func, sz_bb, L, in_dim) f32
       wq/wk/wv: (out_dim, in_dim) f32 (PyTorch nn.Linear weight layout)
       returns: (sz_b, sz_func, sz_bb, out_dim) f32 (== torch forward output)"""
    sz_b, sz_f, sz_bb, L, din = x.shape
    dout = wq.shape[0]
    B = sz_b * sz_f * sz_bb

    # 1/temperature folded into Wq; weights transposed to (din, dout) bf16.
    scale = 1.0 / (float(dout) ** 0.5)
    wq_t = (jnp.asarray(wq, jnp.float32).T * scale).astype(jnp.bfloat16)
    wk_t = jnp.asarray(wk, jnp.float32).T.astype(jnp.bfloat16)
    wv_t = jnp.asarray(wv, jnp.float32).T.astype(jnp.bfloat16)

    xr = jnp.asarray(x, jnp.float32).reshape(B, L, din)
    xf = xr.reshape(B * L, din)      # free reshape (dominant HBM stream)
    x0 = xr[:, 0, :]                 # (B, din) small strided gather of query rows

    # Batch tile: multiple of 8, <= tb_target, and >= 2 grid blocks whenever the
    # batch allows it so the v7x megacore can shard the parallel axis.
    b8 = _round_up(max(B, 1), 8)
    n_grid = max(1, pl.cdiv(b8, tb_target))
    if b8 >= 16:
        n_grid = max(n_grid, 2)
    tb = max(8, _round_up(pl.cdiv(b8, n_grid), 8))

    n_main = B // tb
    rem = B - n_main * tb

    outs = []
    if n_main > 0:
        outs.append(_run_chunk(xf[: n_main * tb * L], x0[: n_main * tb],
                               wq_t, wk_t, wv_t, n_main, tb, L))
    if rem > 0:
        # Ragged tail: pad only this small tail slice (never the full x).
        # Padded rows produce a harmless uniform softmax over zeros and are
        # sliced off below.
        rem8 = _round_up(rem, 8)
        xf_t = xf[n_main * tb * L:]
        x0_t = x0[n_main * tb:]
        if rem8 != rem:
            xf_t = jnp.pad(xf_t, ((0, (rem8 - rem) * L), (0, 0)))
            x0_t = jnp.pad(x0_t, ((0, rem8 - rem), (0, 0)))
        outs.append(_run_chunk(xf_t, x0_t, wq_t, wk_t, wv_t, 1, rem8, L)[:rem])

    out = outs[0] if len(outs) == 1 else jnp.concatenate(outs, axis=0)
    return out.reshape(sz_b, sz_f, sz_bb, dout)


def attention_reference(x, wq, wk, wv):
    """Pure-JAX f32 reference mirroring the PyTorch forward exactly."""
    sz_b, sz_f, sz_bb, L, din = x.shape
    dout = wq.shape[0]
    temperature = float(dout) ** 0.5
    xf = x.reshape(-1, L, din)
    q = xf @ wq.T                                        # (B, L, dout)
    k = xf @ wk.T
    v = xf @ wv.T
    attn = (q / temperature) @ jnp.swapaxes(k, -1, -2)   # (B, L, L)
    attn = jax.nn.softmax(attn, axis=-1)
    out = attn @ v                                       # (B, L, dout)
    out = out.reshape(sz_b, sz_f, sz_bb, L, dout)
    return out[:, :, :, 0, :]


if __name__ == "__main__":
    key = jax.random.PRNGKey(0)
    kx1, kx2, kq, kk, kv = jax.random.split(key, 5)

    in_dim, out_dim = 32, 16
    # Deterministic synthetic weights (nn.Linear weight shape: (out, in)).
    wq = jax.random.normal(kq, (out_dim, in_dim), jnp.float32) * 0.1
    wk = jax.random.normal(kk, (out_dim, in_dim), jnp.float32) * 0.1
    wv = jax.random.normal(kv, (out_dim, in_dim), jnp.float32) * 0.1

    # Tolerance reflects bf16 MXU passes (K=32 contraction), softmax is exact.
    ATOL = RTOL = 2e-2

    # Case 1: batch a multiple of 8, single tile.
    x1 = jax.random.normal(kx1, (2, 2, 2, 8, in_dim), jnp.float32)
    y1 = jax.block_until_ready(attention_forward(x1, wq, wk, wv))
    r1 = attention_reference(x1, wq, wk, wv)
    assert y1.shape == (2, 2, 2, out_dim)
    assert bool(jnp.allclose(y1, r1, atol=ATOL, rtol=RTOL))

    # Case 2: batch not a multiple of the tile — exercises the ragged-tail path.
    x2 = jax.random.normal(kx2, (3, 2, 3, 8, in_dim), jnp.float32)
    y2 = jax.block_until_ready(attention_forward(x2, wq, wk, wv))
    r2 = attention_reference(x2, wq, wk, wv)
    assert y2.shape == (3, 2, 3, out_dim)
    assert bool(jnp.allclose(y2, r2, atol=ATOL, rtol=RTOL))

    # Case 3: small tile target — exercises a multi-block grid plus a tail.
    y3 = jax.block_until_ready(attention_forward(x2, wq, wk, wv, tb_target=8))
    assert y3.shape == (3, 2, 3, out_dim)
    assert bool(jnp.allclose(y3, r2, atol=ATOL, rtol=RTOL))

    print("KERNEL_OK")
</pallas_src>

<mosaic_0001>
module attributes {stable_mosaic.version = 11 : i64} {
  func.func @_attention_kernel(%arg0: i32, %arg1: memref<64x32xf32, #tpu.memory_space<vmem>>, %arg2: memref<8x32xf32, #tpu.memory_space<vmem>>, %arg3: memref<32x16xbf16, #tpu.memory_space<vmem>>, %arg4: memref<32x16xbf16, #tpu.memory_space<vmem>>, %arg5: memref<32x16xbf16, #tpu.memory_space<vmem>>, %arg6: memref<8x16xf32, #tpu.memory_space<vmem>>) attributes {dimension_semantics = [#tpu.dimension_semantics<parallel>], iteration_bounds = array<i64: 1>, scalar_prefetch = 0 : i64, scratch_operands = 0 : i64, tpu.core_type = #tpu.core_type<tc>, window_params = [{transform_indices = @transform_0, window_bounds = array<i64: 64, 32>}, {transform_indices = @transform_1, window_bounds = array<i64: 8, 32>}, {pipeline_mode = #tpu.pipeline_mode<synchronous>, transform_indices = @transform_2, window_bounds = array<i64: 32, 16>}, {pipeline_mode = #tpu.pipeline_mode<synchronous>, transform_indices = @transform_3, window_bounds = array<i64: 32, 16>}, {pipeline_mode = #tpu.pipeline_mode<synchronous>, transform_indices = @transform_4, window_bounds = array<i64: 32, 16>}, {transform_indices = @transform_5, window_bounds = array<i64: 8, 16>}]} {
    %c0 = arith.constant 0 : index
    %c0_0 = arith.constant 0 : index
    %0 = vector.load %arg1[%c0, %c0_0] : memref<64x32xf32, #tpu.memory_space<vmem>>, vector<64x32xf32>
    %1 = arith.truncf %0 : vector<64x32xf32> to vector<64x32xbf16>
    %c0_1 = arith.constant 0 : index
    %c0_2 = arith.constant 0 : index
    %2 = vector.load %arg2[%c0_1, %c0_2] : memref<8x32xf32, #tpu.memory_space<vmem>>, vector<8x32xf32>
    %3 = arith.truncf %2 : vector<8x32xf32> to vector<8x32xbf16>
    %c0_3 = arith.constant 0 : index
    %c0_4 = arith.constant 0 : index
    %4 = vector.load %arg4[%c0_3, %c0_4] : memref<32x16xbf16, #tpu.memory_space<vmem>>, vector<32x16xbf16>
    %cst = arith.constant dense<0.000000e+00> : vector<64x16xf32>
    %5 = tpu.matmul %1, %4, %cst {dimension_numbers = #tpu.dot_dimension_numbers<[1], [0], [0], [1], [0, 0, 1, 1], [], []>} : vector<64x32xbf16>, vector<32x16xbf16>, vector<64x16xf32> -> vector<64x16xf32>
    %c0_5 = arith.constant 0 : index
    %c0_6 = arith.constant 0 : index
    %6 = vector.load %arg5[%c0_5, %c0_6] : memref<32x16xbf16, #tpu.memory_space<vmem>>, vector<32x16xbf16>
    %cst_7 = arith.constant dense<0.000000e+00> : vector<64x16xf32>
    %7 = tpu.matmul %1, %6, %cst_7 {dimension_numbers = #tpu.dot_dimension_numbers<[1], [0], [0], [1], [0, 0, 1, 1], [], []>} : vector<64x32xbf16>, vector<32x16xbf16>, vector<64x16xf32> -> vector<64x16xf32>
    %c0_8 = arith.constant 0 : index
    %c0_9 = arith.constant 0 : index
    %8 = vector.load %arg3[%c0_8, %c0_9] : memref<32x16xbf16, #tpu.memory_space<vmem>>, vector<32x16xbf16>
    %cst_10 = arith.constant dense<0.000000e+00> : vector<8x16xf32>
    %9 = tpu.matmul %3, %8, %cst_10 {dimension_numbers = #tpu.dot_dimension_numbers<[1], [0], [0], [1], [0, 0, 1, 1], [], []>} : vector<8x32xbf16>, vector<32x16xbf16>, vector<8x16xf32> -> vector<8x16xf32>
    %10 = vector.shape_cast %5 : vector<64x16xf32> to vector<8x8x16xf32>
    %11 = vector.shape_cast %7 : vector<64x16xf32> to vector<8x8x16xf32>
    %12 = vector.shape_cast %9 : vector<8x16xf32> to vector<8x1x16xf32>
    %13 = vector.broadcast %12 : vector<8x1x16xf32> to vector<8x8x16xf32>
    %14 = arith.mulf %10, %13 : vector<8x8x16xf32>
    %cst_11 = arith.constant dense<0.000000e+00> : vector<8x8xf32>
    %15 = vector.multi_reduction <add>, %14, %cst_11 [2] : vector<8x8x16xf32> to vector<8x8xf32>
    %cst_12 = arith.constant dense<0xFF800000> : vector<8xf32>
    %16 = vector.multi_reduction <maximumf>, %15, %cst_12 [1] : vector<8x8xf32> to vector<8xf32>
    %17 = vector.shape_cast %16 : vector<8xf32> to vector<8x1xf32>
    %18 = vector.broadcast %17 : vector<8x1xf32> to vector<8x8xf32>
    %19 = arith.subf %15, %18 : vector<8x8xf32>
    %20 = math.exp %19 : vector<8x8xf32>
    %cst_13 = arith.constant dense<0.000000e+00> : vector<8xf32>
    %21 = vector.multi_reduction <add>, %20, %cst_13 [1] : vector<8x8xf32> to vector<8xf32>
    %22 = vector.shape_cast %21 : vector<8xf32> to vector<8x1xf32>
    %23 = vector.broadcast %22 : vector<8x1xf32> to vector<8x8xf32>
    %24 = arith.divf %20, %23 : vector<8x8xf32>
    %25 = vector.shape_cast %24 : vector<8x8xf32> to vector<8x8x1xf32>
    %26 = vector.broadcast %25 : vector<8x8x1xf32> to vector<8x8x16xf32>
    %27 = arith.mulf %26, %11 : vector<8x8x16xf32>
    %cst_14 = arith.constant dense<0.000000e+00> : vector<8x16xf32>
    %28 = vector.multi_reduction <add>, %27, %cst_14 [1] : vector<8x8x16xf32> to vector<8x16xf32>
    %c0_15 = arith.constant 0 : index
    %c0_16 = arith.constant 0 : index
    %29 = vector.load %arg6[%c0_15, %c0_16] : memref<8x16xf32, #tpu.memory_space<vmem>>, vector<8x16xf32>
    tpu.vector_store %arg6[%c0_15, %c0_16], %28 {strides = array<i32>} : memref<8x16xf32, #tpu.memory_space<vmem>>, vector<8x16xf32>,
    return
  }
  func.func @transform_0(%arg0: i32) -> (i32, i32) {
    %c0_i32 = arith.constant 0 : i32
    %c0_i32_0 = arith.constant 0 : i32
    return %arg0, %c0_i32 : i32, i32
  }
  func.func @transform_1(%arg0: i32) -> (i32, i32) {
    %c0_i32 = arith.constant 0 : i32
    %c0_i32_0 = arith.constant 0 : i32
    return %arg0, %c0_i32 : i32, i32
  }
  func.func @transform_2(%arg0: i32) -> (i32, i32) {
    %c0_i32 = arith.constant 0 : i32
    %c0_i32_0 = arith.constant 0 : i32
    %c0_i32_1 = arith.constant 0 : i32
    return %c0_i32, %c0_i32_0 : i32, i32
  }
  func.func @transform_3(%arg0: i32) -> (i32, i32) {
    %c0_i32 = arith.constant 0 : i32
    %c0_i32_0 = arith.constant 0 : i32
    %c0_i32_1 = arith.constant 0 : i32
    return %c0_i32, %c0_i32_0 : i32, i32
  }
  func.func @transform_4(%arg0: i32) -> (i32, i32) {
    %c0_i32 = arith.constant 0 : i32
    %c0_i32_0 = arith.constant 0 : i32
    %c0_i32_1 = arith.constant 0 : i32
    return %c0_i32, %c0_i32_0 : i32, i32
  }
  func.func @transform_5(%arg0: i32) -> (i32, i32) {
    %c0_i32 = arith.constant 0 : i32
    %c0_i32_0 = arith.constant 0 : i32
    return %arg0, %c0_i32 : i32, i32
  }
}

</mosaic_0001>

<bundles_post_ra>
// kernel: tpu_custom_call.1
= control target key start
LH: loop header
LB: loop body
LE: loop exit
PB: predicated region body
PF: predicated region fallthrough
CT: control target
= control target key end

     0   :  { %vm52_vm0 = vcmask 261120   ;;  %v917_v12 = vmov 0.0   ;;  %s1175_s0 = inlined_call_operand.vmem [shape: f32[64,32], index: 0, kind: input, shape index: {}]   ;;  %s1176_s1 = inlined_call_operand.vmem [shape: f32[8,32], index: 1, kind: input, shape index: {}]   ;;  %s1177_s2 = inlined_call_operand.vmem [shape: bf16[32,16], index: 2, kind: input, shape index: {}]   ;;  %s1178_s3 = inlined_call_operand.vmem [shape: bf16[32,16], index: 3, kind: input, shape index: {}]   ;;  %s1179_s4 = inlined_call_operand.vmem [shape: bf16[32,16], index: 4, kind: input, shape index: {}]   ;;  %s1180_s5 = inlined_call_operand.hbm [shape: f32[8,16], index: 5, kind: output, shape index: {}]  }
   0x1   :  { %v855_v0 = vld [vmem:[%s1178_s3] sm:$0xff]   ;;  %v856_v1 = vld [vmem:[%s1178_s3 + $0x8] sm:$0xff]   ;;  %v24_v4 = vld [vmem:[%s1175_s0 + $0x10] sm:$0xff] }
   0x2   :  { %816 = vmatprep.subr.bf16.mxu0 %v855_v0  ;;  %v22_v2 = vld [vmem:[%s1175_s0] sm:$0xff]  ;;  %v23_v3 = vld [vmem:[%s1175_s0 + $0x8] sm:$0xff]  ;;  %v25_v6 = vld [vmem:[%s1175_s0 + $0x18] sm:$0xff] }
   0x3   :  { %817 = vmatpush3.bf16.msra.mxu0 %v855_v0  ;;  %v30_v5 = vpack.c.bf16 %v23_v3, %v22_v2  ;;  %v26_v7 = vld [vmem:[%s1175_s0 + $0x20] sm:$0xff]  ;;  %v27_v8 = vld [vmem:[%s1175_s0 + $0x28] sm:$0xff]  ;;  %v978_v9 = vpack.c.bf16 %v25_v6, %v24_v4 }
   0x4   :  { %818 = vmatprep.subr.bf16.mxu0 %v856_v1  ;;  %v857_v10 = vld [vmem:[%s1177_s2] sm:$0xff]   ;;  %v983_v11 = vpack.c.bf16 %v27_v8, %v26_v7 }
   0x5   :  { %820 = vmatprep.mubr.msk.bf16.mxu0 %vm52_vm0, %v30_v5  ;;  %832 = vmatprep.mubr.msk.bf16.mxu1 %vm52_vm0, %v30_v5 }
   0x7   :  { %819 = vmatpush3.bf16.msra.mxu0 %v856_v1 }
   0x8   :  { %840 = vmatprep.subr.bf16.mxu0 %v917_v12 }
   0x9   :  { %10 = vsyncpa [#allocation3], 0  ;;  %v28_v13 = vld [vmem:[%s1175_s0 + $0x30] sm:$0xff]  ;;  %v29_v14 = vld [vmem:[%s1175_s0 + $0x38] sm:$0xff]  ;;  %vm918_vm1 = vmmov 0   ;;  %v275_v25 = vlaneseq  ;;  %vm368_vm2 = vcmask 130048  }
   0xa   :  { %821 = vmatmul.mubr.msk.bf16.vlgmr.msra.gmra.mrb[0].mxu0 %vm52_vm0, %v978_v9  ;;  %v858_v15 = vld [vmem:[%s1177_s2 + $0x8] sm:$0xff]   ;;  %v998_v16 = vpack.c.bf16 %v29_v14, %v28_v13  ;;  %v34_v17 = vld [vmem:[%s1176_s1] sm:$0xff]  ;;  %v919_v23 = vmov 1966171168   ;;  %vm435_vm3 = vcmask 1041409   ;;  %vm437_vm4 = vcmask 1042434  }
   0xb   :  { %841 = vmatpush3.bf16.msra.mxu0 %v857_v10  ;;  %824 = vmatprep.mubr.msk.bf16.mxu0 %vm52_vm0, %v983_v11  ;;  %v35_v18 = vpack.c.bf16 %v34_v17, %v34_v17  ;;  %v273_v24 = vunpack.c.l.s4 %v919_v23  ;;  %v1006_v29 = vshrl.u32 %v275_v25, 7  ;;  %v402_v13 = vand.u32 127, %v275_v25 }
   0xc   :  { %842 = vmatprep.subr.bf16.mxu0 %v917_v12  ;;  %vm439_vm5 = vcmask 1043459   ;;  %vm441_vm6 = vcmask 1044484   ;;  %vm443_vm7 = vcmask 1045509   ;;  %vm445_vm8 = vcmask 1046534  }
   0xd   :  { %v274_v28 = vunpack.c.0.s8 %v273_v24  ;;  %v1010_v37 = vsub.s32 0, %v1006_v29  ;;  %vm447_vm9 = vcmask 1047559   ;;  %vm450_vm10 = vcmask 64512  }
   0xf   :  { %843 = vmatpush3.bf16.msra.mxu0 %v858_v15  ;;  %v277_v32 = vsub.s32 %v274_v28, %v1006_v29  ;;  %v1029_v15 = vsub.s32 %v402_v13, %v1006_v29 }
  0x12   :  { %825 = vmatmul.mubr.msk.bf16.gmra.mrb[4].mxu0 %vm52_vm0, %v998_v16 }
  0x13   :  { %844 = vmatprep.mubr.msk.bf16.mxu0 %vm918_vm1, %v917_v12 }
  0x1a   :  { %845 = vmatmul.mubr.msk.bf16.vlgmr.msra.gmra.mrb[8].mxu0 %vm52_vm0, %v35_v18 }
  0xdd   :  { %v822_v19 = vpop.f32.mrb[0].mxu0 }
  0xde   :  { %v99_v20 = vpop.f32.mrb[1].mxu0 }
  0xdf   :  { %v823_v21 = vpop.f32.mrb[2].mxu0 }
  0xe0   :  { %v102_v22 = vpop.f32.mrb[3].mxu0 }
  0xe5   :  { %v826_v26 = vpop.f32.mrb[4].mxu0 }
  0xe6   :  { %v115_v27 = vpop.f32.mrb[5].mxu0 }
  0xe7   :  { %v827_v30 = vpop.f32.mrb[6].mxu0 }
  0xe8   :  { %v118_v31 = vpop.f32.mrb[7].mxu0 }
  0xed   :  { %v264_v33 = vpop.f32.mrb[8].mxu0 }
  0xee   :  { %v271_v34 = vcombine.high %v264_v33, %v264_v33  ;;  %v278_v35 = vrot.slane %v264_v33, %v277_v32  ;;  %v846_v36 = vpop.f32.mrb[9].mxu0 }
  0xef   :  { %v267_v38 = vpop.f32.mrb[10].mxu0 }
  0xf0   :  { %v285_v39 = vrot.slane %v271_v34, %v277_v32  ;;  %v286_v40 = vcombine.high %v278_v35, %v278_v35  ;;  %v294_v41 = vrot.slane %v278_v35, %v277_v32  ;;  %v847_v42 = vpop.f32.mrb[11].mxu0 }
  0xf1   :  { %v920_v42 = vmov 0  }
  0xf2   :  { %v287_v43 = vcombine.high %v285_v39, %v285_v39  ;;  %v301_v44 = vrot.slane %v285_v39, %v277_v32  ;;  %v308_v45 = vrot.slane %v286_v40, %v277_v32  ;;  %v323_v46 = vrot.slane %v294_v41, %v1010_v37  ;;  %854 = vset.pattern.permute.xlu0 %v920_v42 }
  0xf3   :  { %v316_v47 = vcombine.high %v294_v41, %v294_v41  ;;  %853 = vset.pattern.permute.xlu1 %v920_v42 }
  0xf4   :  { %v360_v48 = vmul.f32 %v323_v46, %v99_v20  ;;  %v327_v49 = vrot.slane %v308_v45, %v1010_v37  ;;  %v318_v50 = vcombine.high %v308_v45, %v308_v45  ;;  %v339_v51 = vrot.slane %v301_v44, %v1010_v37 }
  0xf5   :  { %v331_v52 = vrot.slane %v316_v47, %v1010_v37  ;;  %v315_v53 = vrot.slane %v287_v43, %v277_v32  ;;  %v317_v54 = vcombine.high %v301_v44, %v301_v44  ;;  %v461_v43 = vsub.s32 1, %v1006_v29 }
  0xf6   :  { %v369_v55 = vsel %vm368_vm2, %v360_v48, 0.0  ;;  %v361_v56 = vmul.f32 %v327_v49, %v102_v22  ;;  %v335_v57 = vrot.slane %v318_v50, %v1010_v37  ;;  %v364_v58 = vmul.f32 %v339_v51, %v115_v27 }
  0xf7   :  { %370 = vadd.xlane.f32.xlu0 %v369_v55  ;;  %v362_v59 = vmul.f32 %v822_v19, %v331_v52  ;;  %v343_v60 = vrot.slane %v315_v53, %v1010_v37  ;;  %v347_v61 = vrot.slane %v317_v54, %v1010_v37  ;;  %v319_v62 = vcombine.high %v315_v53, %v315_v53 }
  0xf8   :  { %v363_v63 = vmul.f32 %v823_v21, %v335_v57  ;;  %v372_v4 = vsel %vm368_vm2, %v361_v56, 0.0  ;;  %v381_v7 = vsel %vm368_vm2, %v364_v58, 0.0  ;;  %v465_v44 = vsub.s32 2, %v1006_v29 }
  0xf9   :  { %v375_v0 = vsel %vm368_vm2, %v362_v59, 0.0  ;;  %v365_v1 = vmul.f32 %v343_v60, %v118_v31  ;;  %v366_v2 = vmul.f32 %v826_v26, %v347_v61  ;;  %v351_v3 = vrot.slane %v319_v62, %v1010_v37 }
  0xfa   :  { %376 = vadd.xlane.f32.xlu1 %v375_v0  ;;  %v378_v6 = vsel %vm368_vm2, %v363_v63, 0.0  ;;  %v469_v45 = vsub.s32 3, %v1006_v29  ;;  %v473_v50 = vsub.s32 4, %v1006_v29  ;;  %v477_v57 = vsub.s32 5, %v1006_v29 }
  0xfb   :  { %373 = vadd.xlane.f32.xlu0 %v372_v4  ;;  %v367_v5 = vmul.f32 %v827_v30, %v351_v3  ;;  %v384_v8 = vsel %vm368_vm2, %v365_v1, 0.0  ;;  %v387_v10 = vsel %vm368_vm2, %v366_v2, 0.0  ;;  %v481_v61 = vsub.s32 6, %v1006_v29 }
  0xfc   :  { %v485_v1 = vsub.s32 7, %v1006_v29 }
  0xfd   :  { %v390_v12 = vsel %vm368_vm2, %v367_v5, 0.0 }
  0xfe   :  { %379 = vadd.xlane.f32.xlu1 %v378_v6 }
  0xff   :  { %382 = vadd.xlane.f32.xlu0 %v381_v7 }
 0x102   :  { %385 = vadd.xlane.f32.xlu1 %v384_v8 }
 0x103   :  { %388 = vadd.xlane.f32.xlu0 %v387_v10 }
 0x106   :  { %391 = vadd.xlane.f32.xlu1 %v390_v12 }
 0x184   :  { %v371_v14 = vpop.xlane.xlu0 %370 }
 0x185   :  { %v406_v19 = vrot.slane %v371_v14, %v1029_v15 }
 0x187   :  { %v377_v17 = vpop.xlane.xlu1 %376 }
 0x188   :  { %v374_v18 = vpop.xlane.xlu0 %373  ;;  %v414_v21 = vrot.slane %v377_v17, %v1029_v15 }
 0x189   :  { %v410_v20 = vrot.slane %v374_v18, %v1029_v15 }
 0x18b   :  { %v436_v22 = vsel %vm435_vm3, %v410_v20, %v406_v19  ;;  %v380_v23 = vpop.xlane.xlu1 %379 }
 0x18c   :  { %v438_v24 = vsel %vm437_vm4, %v414_v21, %v436_v22  ;;  %v418_v25 = vrot.slane %v380_v23, %v1029_v15  ;;  %v383_v26 = vpop.xlane.xlu0 %382 }
 0x18d   :  { %v422_v27 = vrot.slane %v383_v26, %v1029_v15 }
 0x18e   :  { %v440_v28 = vsel %vm439_vm5, %v418_v25, %v438_v24  ;;  %v860_v24 = vld [vmem:[%s1179_s4 + $0x8] sm:$0xff]  }
 0x18f   :  { %v442_v30 = vsel %vm441_vm6, %v422_v27, %v440_v28  ;;  %v386_v31 = vpop.xlane.xlu1 %385 }
 0x190   :  { %v426_v32 = vrot.slane %v386_v31, %v1029_v15  ;;  %v389_v33 = vpop.xlane.xlu0 %388 }
 0x191   :  { %v430_v34 = vrot.slane %v389_v33, %v1029_v15 }
 0x192   :  { %v444_v35 = vsel %vm443_vm7, %v426_v32, %v442_v30 }
 0x193   :  { %v392_v36 = vpop.xlane.xlu1 %391  ;;  %v446_v38 = vsel %vm445_vm8, %v430_v34, %v444_v35 }
 0x194   :  { %v434_v39 = vrot.slane %v392_v36, %v1029_v15 }
 0x196   :  { %v448_v40 = vsel %vm447_vm9, %v434_v39, %v446_v38 }
 0x197   :  { %v451_v41 = vsel %vm450_vm10, %v448_v40, -inf }
 0x198   :  { %452 = vmax.xlane.f32.xlu0 %v451_v41 }
 0x225   :  { %v453_v46 = vpop.xlane.xlu0 %452 }
 0x226   :  { %v458_v47 = vrot.slane %v453_v46, %v1010_v37  ;;  %v462_v48 = vrot.slane %v453_v46, %v461_v43  ;;  %v466_v49 = vrot.slane %v453_v46, %v465_v44  ;;  %v470_v51 = vrot.slane %v453_v46, %v469_v45 }
 0x227   :  { %v474_v58 = vrot.slane %v453_v46, %v473_v50  ;;  %v478_v62 = vrot.slane %v453_v46, %v477_v57  ;;  %v482_v2 = vrot.slane %v453_v46, %v481_v61  ;;  %v486_v7 = vrot.slane %v453_v46, %v485_v1 }
 0x228   :  { %v495_v52 = vsub.f32 %v371_v14, %v458_v47  ;;  %v496_v53 = vsub.f32 %v374_v18, %v462_v48  ;;  %v497_v54 = vsub.f32 %v377_v17, %v466_v49  ;;  %v498_v59 = vsub.f32 %v380_v23, %v470_v51  ;;  %v859_v23 = vld [vmem:[%s1179_s4] sm:$0xff]   ;;  %s921_s4 = smov [#allocation2]  }
 0x229   :  { %v499_v63 = vsub.f32 %v383_v26, %v474_v58  ;;  %v500_v3 = vsub.f32 %v386_v31, %v478_v62  ;;  %v501_v8 = vsub.f32 %v389_v33, %v482_v2  ;;  %v502_v13 = vsub.f32 %v392_v36, %v486_v7  ;;  %828 = vmatprep.subr.bf16.mxu1 %v859_v23  ;;  %s778_s19 = sshll.u32 %s921_s4, 4  ;;  %s779_s19 = int_to_ptr.vmem [resolvable:$true] %s778_s19 }
 0x22a   :  { %v503_v55 = vmul.f32 1.442695, %v495_v52  ;;  %v505_v56 = vmul.f32 1.442695, %v496_v53  ;;  %v507_v60 = vmul.f32 1.442695, %v497_v54  ;;  %829 = vmatpush3.bf16.msra.mxu1 %v859_v23  ;;  %p898_p1 = scmp.lt.s32.totalorder %s779_s19, %s779_s19 }
 0x22b   :  { %v509_v0 = vmul.f32 1.442695, %v498_v59  ;;  %v511_v4 = vmul.f32 1.442695, %v499_v63  ;;  %v513_v10 = vmul.f32 1.442695, %v500_v3  ;;  %830 = vmatprep.subr.bf16.mxu1 %v860_v24 }
 0x22c   :  { %861 = vpow2.f32 %v503_v55  ;;  %v515_v14 = vmul.f32 1.442695, %v501_v8  ;;  %v517_v18 = vmul.f32 1.442695, %v502_v13  ;;  %s893_s20 = scalar_lea.vmem %s779_s19, 128 }
 0x22d   :  { %863 = vpow2.f32 %v505_v56  ;;  %p894_p0 = scmp.ne.s32.totalorder %s779_s19, %s893_s20  ;;  %p899_p2 = scmp.lt.s32.totalorder %s893_s20, %s893_s20 }
 0x22e   :  { %865 = vpow2.f32 %v507_v60  ;;  %831 = vmatpush3.bf16.msra.mxu1 %v860_v24 }
 0x22f   :  { %867 = vpow2.f32 %v509_v0  ;;  %p900_p3 = por %p899_p2, %p898_p1 }
 0x230   :  { %869 = vpow2.f32 %v511_v4 }
 0x231   :  { %871 = vpow2.f32 %v513_v10  ;;  %833 = vmatmul.mubr.msk.bf16.vlgmr.msra.gmra.mrb[0].mxu1 %vm52_vm0, %v978_v9  ;;  %p901_p4 = pnand %p900_p3, %p894_p0 }
 0x232   :  { %873 = vpow2.f32 %v515_v14  ;;  %836 = vmatprep.mubr.msk.bf16.mxu1 %vm52_vm0, %v983_v11 }
 0x233   :  { %875 = vpow2.f32 %v517_v18 }
 0x236   :  { %v1067_v5 = vpop.eup %861 }
 0x237   :  { %v1069_v6 = vpop.eup %863  ;;  %528 = vperm.xlu1 %853, %v1067_v5  }
 0x238   :  { %531 = vperm.xlu0 %854, %v1069_v6   ;;  %v1075_v12 = vpop.eup %865 }
 0x239   :  { %v1078_v17 = vpop.eup %867  ;;  %837 = vmatmul.mubr.msk.bf16.gmra.mrb[4].mxu1 %vm52_vm0, %v998_v16 }
 0x23a   :  { %v1081_v19 = vpop.eup %869 }
 0x23b   :  { %534 = vperm.xlu1 %853, %v1075_v12   ;;  %v1084_v20 = vpop.eup %871 }
 0x23c   :  { %v1087_v21 = vpop.eup %873 }
 0x23d   :  { %v1090_v22 = vpop.eup %875 }
 0x23f   :  { %537 = vperm.xlu1 %853, %v1078_v17  }
 0x243   :  { %540 = vperm.xlu1 %853, %v1081_v19  }
 0x247   :  { %543 = vperm.xlu1 %853, %v1084_v20  }
 0x24b   :  { %546 = vperm.xlu1 %853, %v1087_v21  }
 0x24f   :  { %549 = vperm.xlu1 %853, %v1090_v22  }
 0x2b6   :  { %v529_v25 = vpop.permute.xlu1 %528 }
 0x2b7   :  { %v532_v30 = vpop.permute.xlu0 %531  ;;  %v554_v33 = vrot.slane %v529_v25, %v1029_v15 }
 0x2b8   :  { %v558_v32 = vrot.slane %v532_v30, %v1029_v15 }
 0x2ba   :  { %v535_v26 = vpop.permute.xlu1 %534  ;;  %v583_v36 = vsel %vm435_vm3, %v558_v32, %v554_v33 }
 0x2bb   :  { %v562_v34 = vrot.slane %v535_v26, %v1029_v15 }
 0x2bd   :  { %v584_v38 = vsel %vm437_vm4, %v562_v34, %v583_v36 }
 0x2be   :  { %v538_v27 = vpop.permute.xlu1 %537 }
 0x2bf   :  { %v566_v9 = vrot.slane %v538_v27, %v1029_v15 }
 0x2c1   :  { %v585_v40 = vsel %vm439_vm5, %v566_v9, %v584_v38 }
 0x2c2   :  { %v541_v28 = vpop.permute.xlu1 %540 }
 0x2c3   :  { %v570_v35 = vrot.slane %v541_v28, %v1029_v15 }
 0x2c5   :  { %v586_v41 = vsel %vm441_vm6, %v570_v35, %v585_v40 }
 0x2c6   :  { %v544_v31 = vpop.permute.xlu1 %543 }
 0x2c7   :  { %v574_v16 = vrot.slane %v544_v31, %v1029_v15 }
 0x2c9   :  { %v587_v46 = vsel %vm443_vm7, %v574_v16, %v586_v41 }
 0x2ca   :  { %v547_v11 = vpop.permute.xlu1 %546 }
 0x2cb   :  { %v578_v39 = vrot.slane %v547_v11, %v1029_v15 }
 0x2cd   :  { %v588_v48 = vsel %vm445_vm8, %v578_v39, %v587_v46 }
 0x2ce   :  { %v550_v42 = vpop.permute.xlu1 %549 }
 0x2cf   :  { %v582_v47 = vrot.slane %v550_v42, %v1029_v15 }
 0x2d1   :  { %v589_v49 = vsel %vm447_vm9, %v582_v47, %v588_v48 }
 0x2d2   :  { %v591_v51 = vsel %vm450_vm10, %v589_v49, 0.0 }
 0x2d3   :  { %592 = vadd.xlane.f32.xlu1 %v591_v51 }
 0x304   :  { %v834_v52 = vpop.f32.mrb[0].mxu1 }
 0x305   :  { %v180_v53 = vpop.f32.mrb[1].mxu1 }
 0x306   :  { %v835_v3 = vpop.f32.mrb[2].mxu1 }
 0x360   :  { %v593_v54 = vpop.xlane.xlu1 %592 }
 0x361   :  { %v598_v55 = vrot.slane %v593_v54, %v1010_v37  ;;  %v602_v56 = vrot.slane %v593_v54, %v461_v43  ;;  %v606_v15 = vrot.slane %v593_v54, %v465_v44  ;;  %v610_v58 = vrot.slane %v593_v54, %v469_v45 }
 0x362   :  { %v614_v60 = vrot.slane %v593_v54, %v473_v50  ;;  %v618_v43 = vrot.slane %v593_v54, %v477_v57  ;;  %v622_v45 = vrot.slane %v593_v54, %v481_v61  ;;  %v626_v50 = vrot.slane %v593_v54, %v485_v1  ;;  %v183_v57 = vpop.f32.mrb[3].mxu1 }
 0x363   :  { %877 = vrcp.f32 %v598_v55  ;;  %v838_v10 = vpop.f32.mrb[4].mxu1 }
 0x364   :  { %879 = vrcp.f32 %v602_v56  ;;  %v196_v29 = vpop.f32.mrb[5].mxu1 }
 0x365   :  { %881 = vrcp.f32 %v606_v15  ;;  %v1143_v13 = vpop.f32.mrb[6].mxu1 }
 0x366   :  { %883 = vrcp.f32 %v610_v58 }
 0x367   :  { %885 = vrcp.f32 %v614_v60 }
 0x368   :  { %887 = vrcp.f32 %v618_v43 }
 0x369   :  { %889 = vrcp.f32 %v622_v45 }
 0x36a   :  { %891 = vrcp.f32 %v626_v50 }
 0x36d   :  { %v878_v59 = vpop.eup %877 }
 0x36e   :  { %v636_v62 = vmul.f32 %v878_v59, %v1067_v5  ;;  %v880_v37 = vpop.eup %879 }
 0x36f   :  { %v638_v63 = vmul.f32 %v880_v37, %v1069_v6  ;;  %v882_v44 = vpop.eup %881 }
 0x370   :  { %653 = vperm.xlu0 %854, %v636_v62   ;;  %v640_v0 = vmul.f32 %v882_v44, %v1075_v12  ;;  %v884_v2 = vpop.eup %883 }
 0x371   :  { %v642_v4 = vmul.f32 %v884_v2, %v1078_v17  ;;  %v886_v5 = vpop.eup %885  ;;  %v199_v17 = vpop.f32.mrb[7].mxu1 }
 0x372   :  { %v644_v6 = vmul.f32 %v886_v5, %v1081_v19  ;;  %v888_v7 = vpop.eup %887 }
 0x373   :  { %v646_v61 = vmul.f32 %v888_v7, %v1084_v20  ;;  %v890_v8 = vpop.eup %889 }
 0x374   :  { %658 = vperm.xlu0 %854, %v638_v63   ;;  %v648_v12 = vmul.f32 %v890_v8, %v1087_v21  ;;  %v892_v1 = vpop.eup %891 }
 0x375   :  { %v650_v14 = vmul.f32 %v892_v1, %v1090_v22 }
 0x378   :  { %663 = vperm.xlu0 %854, %v640_v0  }
 0x37c   :  { %668 = vperm.xlu0 %854, %v642_v4  }
 0x380   :  { %673 = vperm.xlu0 %854, %v644_v6  }
 0x384   :  { %678 = vperm.xlu0 %854, %v646_v61  }
 0x388   :  { %683 = vperm.xlu0 %854, %v648_v12  }
 0x38c   :  { %688 = vperm.xlu0 %854, %v650_v14  }
 0x3ef   :  { %v654_v18 = vpop.permute.xlu0 %653 }
 0x3f0   :  { %v691_v19 = vmul.f32 %v654_v18, %v180_v53 }
 0x3f2   :  { %v699_v23 = vsel %vm368_vm2, %v691_v19, 0.0 }
 0x3f3   :  { %v700_v24 = vrot.slane %v699_v23, 4  ;;  %v659_v20 = vpop.permute.xlu0 %658 }
 0x3f4   :  { %v692_v25 = vmul.f32 %v659_v20, %v183_v57 }
 0x3f5   :  { %v701_v26 = vadd.f32 %v700_v24, %v699_v23 }
 0x3f6   :  { %v706_v27 = vsel %vm368_vm2, %v692_v25, 0.0 }
 0x3f7   :  { %v702_v21 = vrot.slane %v701_v26, 2  ;;  %v707_v28 = vrot.slane %v706_v27, 4  ;;  %v664_v30 = vpop.permute.xlu0 %663 }
 0x3f8   :  { %v693_v31 = vmul.f32 %v834_v52, %v664_v30 }
 0x3f9   :  { %v703_v32 = vadd.f32 %v702_v21, %v701_v26  ;;  %v708_v33 = vadd.f32 %v707_v28, %v706_v27 }
 0x3fa   :  { %v713_v22 = vsel %vm368_vm2, %v693_v31, 0.0 }
 0x3fb   :  { %v709_v34 = vrot.slane %v708_v33, 2  ;;  %v714_v9 = vrot.slane %v713_v22, 4  ;;  %v669_v35 = vpop.permute.xlu0 %668  ;;  %v704_v36 = vrot.slane %v703_v32, 1 }
 0x3fc   :  { %v694_v11 = vmul.f32 %v835_v3, %v669_v35 }
 0x3fd   :  { %v710_v16 = vadd.f32 %v709_v34, %v708_v33  ;;  %v715_v38 = vadd.f32 %v714_v9, %v713_v22  ;;  %v705_v48 = vadd.f32 %v704_v36, %v703_v32 }
 0x3fe   :  { %v720_v39 = vsel %vm368_vm2, %v694_v11, 0.0 }
 0x3ff   :  { %v711_v40 = vrot.slane %v710_v16, 1  ;;  %v716_v41 = vrot.slane %v715_v38, 2  ;;  %v721_v42 = vrot.slane %v720_v39, 4  ;;  %v674_v46 = vpop.permute.xlu0 %673 }
 0x400   :  { %v695_v47 = vmul.f32 %v674_v46, %v196_v29 }
 0x401   :  { %v712_v49 = vadd.f32 %v711_v40, %v710_v16  ;;  %v717_v51 = vadd.f32 %v716_v41, %v715_v38  ;;  %v722_v52 = vadd.f32 %v721_v42, %v720_v39 }
 0x402   :  { %v727_v53 = vsel %vm368_vm2, %v695_v47, 0.0 }
 0x403   :  { %v763_v54 = vsel %vm435_vm3, %v712_v49, %v705_v48  ;;  %v718_v55 = vrot.slane %v717_v51, 1  ;;  %v723_v56 = vrot.slane %v722_v52, 2  ;;  %v728_v15 = vrot.slane %v727_v53, 4  ;;  %v679_v58 = vpop.permute.xlu0 %678 }
 0x404   :  { %v696_v59 = vmul.f32 %v679_v58, %v199_v17 }
 0x405   :  { %v719_v60 = vadd.f32 %v718_v55, %v717_v51  ;;  %v724_v62 = vadd.f32 %v723_v56, %v722_v52  ;;  %v729_v37 = vadd.f32 %v728_v15, %v727_v53 }
 0x406   :  { %v734_v43 = vsel %vm368_vm2, %v696_v59, 0.0 }
 0x407   :  { %v764_v63 = vsel %vm437_vm4, %v719_v60, %v763_v54  ;;  %v725_v44 = vrot.slane %v724_v62, 1  ;;  %v730_v45 = vrot.slane %v729_v37, 2  ;;  %v735_v0 = vrot.slane %v734_v43, 4  ;;  %v684_v2 = vpop.permute.xlu0 %683 }
 0x408   :  { %v697_v50 = vmul.f32 %v838_v10, %v684_v2 }
 0x409   :  { %v726_v3 = vadd.f32 %v725_v44, %v724_v62  ;;  %v731_v4 = vadd.f32 %v730_v45, %v729_v37  ;;  %v736_v57 = vadd.f32 %v735_v0, %v734_v43 }
 0x40a   :  { %v741_v5 = vsel %vm368_vm2, %v697_v50, 0.0 }
 0x40b   :  { %v732_v6 = vrot.slane %v731_v4, 1  ;;  %v737_v7 = vrot.slane %v736_v57, 2  ;;  %v742_v61 = vrot.slane %v741_v5, 4  ;;  %v689_v8 = vpop.permute.xlu0 %688  ;;  %v765_v12 = vsel %vm439_vm5, %v726_v3, %v764_v63 }
 0x40c   :  { %v698_v29 = vmul.f32 %v1143_v13, %v689_v8 }
 0x40d   :  { %v733_v1 = vadd.f32 %v732_v6, %v731_v4  ;;  %v738_v14 = vadd.f32 %v737_v7, %v736_v57  ;;  %v743_v17 = vadd.f32 %v742_v61, %v741_v5 }
 0x40e   :  { %v748_v18 = vsel %vm368_vm2, %v698_v29, 0.0 }
 0x40f   :  { %v739_v19 = vrot.slane %v738_v14, 1  ;;  %v744_v10 = vrot.slane %v743_v17, 2  ;;  %v749_v23 = vrot.slane %v748_v18, 4  ;;  %v766_v24 = vsel %vm441_vm6, %v733_v1, %v765_v12 }
 0x411   :  { %v740_v20 = vadd.f32 %v739_v19, %v738_v14  ;;  %v745_v25 = vadd.f32 %v744_v10, %v743_v17  ;;  %v750_v26 = vadd.f32 %v749_v23, %v748_v18 }
 0x413   :  { %v746_v27 = vrot.slane %v745_v25, 1  ;;  %v751_v21 = vrot.slane %v750_v26, 2  ;;  %v767_v28 = vsel %vm443_vm7, %v740_v20, %v766_v24 }
 0x415   :  { %v747_v30 = vadd.f32 %v746_v27, %v745_v25  ;;  %v752_v31 = vadd.f32 %v751_v21, %v750_v26 }
 0x417   :  { %v753_v13 = vrot.slane %v752_v31, 1  ;;  %v768_v32 = vsel %vm445_vm8, %v747_v30, %v767_v28 }
 0x419   :  { %v754_v33 = vadd.f32 %v753_v13, %v752_v31 }
 0x41b   :  { %v769_v22 = vsel %vm447_vm9, %v754_v33, %v768_v32 }
 0x41c   :  { %771 = vst.msk [vmem:[#allocation2] sm:$0xff] %vm368_vm2, %v769_v22 }
 0x41d   :  { %904 = shalt.err (!%p901_p4)
}
 0x41e   :  { %s905_s23 = scalar_lea.hbm %s1180_s5, 128 }
 0x41f   :  { %p906_p5 = scmp.ne.s32.totalorder %s1180_s5, %s905_s23  ;;  %p909_p6 = scmp.lt.u32.totalorder %s905_s23, %s1180_s5 }
 0x421   :  { %p911_p7 = pnand %p909_p6, %p906_p5 }
 0x423   :  { %914 = shalt.err (!%p911_p7)
}
 0x424   :  { %781 = dma.vmem_to_hbm [thread:$0]  %s779_s19, 128, %s1180_s5, [#allocation3]  }
 0x425   :  { %915 = dma.done.wait [#allocation3], 128  }
 0x426   :  { %916 = vsyncadd [#allocation3], 4294967168 }
 0x427   :  { %785 = vsyncpa [#allocation3], 1 }

</bundles_post_ra>
